<compile_context>
chip_gen: v5e
topology: v5e:2x2
jax: 0.10.0
libtpu: 0.0.40
codegen_flags: <defaults>
</compile_context>

<pallas_src>
import jax
import jax.numpy as jnp
from jax import lax
from jax.experimental import pallas as pl
from jax.experimental.pallas import tpu as pltpu

_NEG_BIG = -1e30  # bias for padded class lanes (finite, avoids inf-inf NaNs)


def _decoder_kernel(x_ref, w_ref, b_ref, o_ref):
    # x_ref: (1, D, tT)  NCW activation block (one batch elem / one time tile)
    # w_ref: (D, Cp)     full (class-padded) weight, constant across the grid
    # b_ref: (1, Cp)     full (class-padded) bias; padded lanes carry -1e30
    # o_ref: (1, tT, C)  UNPADDED output tile -- only real classes hit HBM
    x_dt = x_ref[0]                                         # (D, tT)

    # Contract over D without materializing a transposed activation in HBM:
    # (D, tT) x (D, Cp) -> (tT, Cp) on the MXU, f32 accumulation.
    logits = lax.dot_general(
        x_dt, w_ref[...],
        dimension_numbers=(((0,), (0,)), ((), ())),
        preferred_element_type=jnp.float32)                 # (tT, Cp)
    logits = logits + b_ref[...]                            # broadcast (1, Cp)

    # Row-wise (per time step) numerically stable log_softmax, in f32.
    # Padded classes carry a -1e30 bias -> exp() underflows to exactly 0, so
    # they do not perturb the normalization of the real classes.
    # NOTE: on a ragged edge time block the out-of-bounds rows hold undefined
    # data; this is benign because every op here is row-wise and those rows
    # are never stored -- do not introduce cross-row reductions here.
    m = jnp.max(logits, axis=-1, keepdims=True)
    shifted = logits - m
    lse = jnp.log(jnp.sum(jnp.exp(shifted), axis=-1, keepdims=True))
    logp = shifted - lse                                    # (tT, Cp), f32

    # Slice the real classes *before* the dtype cast so padded lanes never
    # reach HBM; the masked tail vst is far cheaper than a Cp-wide HBM write.
    C = o_ref.shape[-1]
    o_ref[0] = logp[:, :C].astype(o_ref.dtype)


def conformer_decoder(encoder_output, weight, bias, *, time_tile=512,
                      out_dtype=jnp.float32):
    """
    encoder_output: (B, D, T) float32   (PyTorch NCW layout)
    weight:         (C, D)   float32    (Conv1d weight, kernel_size=1, squeezed)
    bias:           (C,)     float32
    returns:        (B, T, C) log-probabilities (out_dtype, default float32)
    """
    B, D, T = encoder_output.shape
    C = weight.shape[0]

    # Class dim padded to a lane-dense multiple of 128 for the in-VMEM math
    # only (the HBM output stays at C).
    Cp = ((C + 127) // 128) * 128

    # Parameters are tiny: prepare them channels-last / padded in plain JAX.
    w_dc = jnp.transpose(weight, (1, 0)).astype(jnp.float32)   # (D, C)
    if Cp != C:
        w_dc = jnp.pad(w_dc, ((0, 0), (0, Cp - C)))             # zero weights
        b_p = jnp.pad(bias.astype(jnp.float32), (0, Cp - C),
                      constant_values=_NEG_BIG)                 # -> effectively -inf
    else:
        b_p = bias.astype(jnp.float32)
    b_1c = b_p.reshape(1, Cp)

    # Time tile: largest multiple of 128 <= min(T, time_tile); full-T blocks
    # only when T < 128.  Remainder handled by the cdiv grid + edge masking.
    if T >= 128:
        tT = max(128, (min(T, int(time_tile)) // 128) * 128)
    else:
        tT = T
    n_t = pl.cdiv(T, tT)

    # Explicit scoped-VMEM budget: double-buffered x/out blocks + resident
    # (padded) params + headroom for the (tT, Cp) f32 intermediates.
    block_bytes = (2 * D * tT * 4            # x blocks (double-buffered)
                   + 2 * tT * C * 4          # out blocks (double-buffered, unpadded)
                   + 2 * (D * Cp + Cp) * 4   # weight + bias (conservatively x2)
                   + 2 * tT * Cp * 4)        # in-kernel f32 intermediates / spill
    vmem_limit = int(min(max(block_bytes + (4 << 20), 16 << 20), 64 << 20))

    out = pl.pallas_call(
        _decoder_kernel,
        out_shape=jax.ShapeDtypeStruct((B, T, C), out_dtype),
        grid_spec=pltpu.PrefetchScalarGridSpec(
            num_scalar_prefetch=0,
            grid=(B, n_t),
            in_specs=[
                # NCW activation read directly; D kept un-tiled (full).
                pl.BlockSpec((1, D, tT), lambda b, t: (b, 0, t)),
                # Weight / bias: constant index_map -> fetched once, resident.
                # (Single-buffering these via pipeline_mode would halve their
                #  VMEM footprint for large D/vocab on v7x; left at default
                #  buffering for portability.)
                pl.BlockSpec((D, Cp), lambda b, t: (0, 0)),
                pl.BlockSpec((1, Cp), lambda b, t: (0, 0)),
            ],
            # Unpadded, lane-tight output tile; last dim = full C is legal.
            out_specs=pl.BlockSpec((1, tT, C), lambda b, t: (b, t, 0)),
        ),
        compiler_params=pltpu.CompilerParams(
            dimension_semantics=("parallel", "parallel"),
            vmem_limit_bytes=vmem_limit),
    )(encoder_output, w_dc, b_1c)
    return out


if __name__ == "__main__":
    # Small shapes consistent with the module's forward:
    #   feat_in = 32, num_classes = 7  -> C = num_classes + 1 = 8
    B, D, T = 2, 32, 16
    num_classes = 7
    C = num_classes + 1

    key = jax.random.PRNGKey(0)
    k_x, k_w, k_b = jax.random.split(key, 3)

    encoder_output = jax.random.normal(k_x, (B, D, T), dtype=jnp.float32)
    # deterministic synthetic Conv1d(kernel_size=1) parameters
    weight = jax.random.normal(k_w, (C, D), dtype=jnp.float32) * 0.1
    bias = jax.random.normal(k_b, (C,), dtype=jnp.float32) * 0.1

    log_probs = conformer_decoder(encoder_output, weight, bias)
    log_probs = jax.block_until_ready(log_probs)

    # sanity: reference in plain JAX
    ref_logits = jnp.einsum("bdt,cd->btc", encoder_output, weight) + bias
    ref = jax.nn.log_softmax(ref_logits, axis=-1)
    assert log_probs.shape == (B, T, C)
    assert jnp.allclose(log_probs, ref, atol=1e-5, rtol=1e-5)

    print("KERNEL_OK")
</pallas_src>

<mosaic_0001>
module attributes {stable_mosaic.version = 11 : i64} {
  func.func @_decoder_kernel(%arg0: i32, %arg1: i32, %arg2: memref<1x32x16xf32, #tpu.memory_space<vmem>>, %arg3: memref<32x128xf32, #tpu.memory_space<vmem>>, %arg4: memref<1x128xf32, #tpu.memory_space<vmem>>, %arg5: memref<1x16x8xf32, #tpu.memory_space<vmem>>) attributes {dimension_semantics = [#tpu.dimension_semantics<parallel>, #tpu.dimension_semantics<parallel>], iteration_bounds = array<i64: 2, 1>, scalar_prefetch = 0 : i64, scratch_operands = 0 : i64, tpu.core_type = #tpu.core_type<tc>, window_params = [{transform_indices = @transform_0, window_bounds = array<i64: 1, 32, 16>}, {pipeline_mode = #tpu.pipeline_mode<synchronous>, transform_indices = @transform_1, window_bounds = array<i64: 32, 128>}, {pipeline_mode = #tpu.pipeline_mode<synchronous>, transform_indices = @transform_2, window_bounds = array<i64: 1, 128>}, {transform_indices = @transform_3, window_bounds = array<i64: 1, 16, 8>}]} {
    %c0 = arith.constant 0 : index
    %c0_0 = arith.constant 0 : index
    %c0_1 = arith.constant 0 : index
    %0 = vector.load %arg2[%c0, %c0_0, %c0_1] : memref<1x32x16xf32, #tpu.memory_space<vmem>>, vector<1x32x16xf32>
    %1 = vector.shape_cast %0 : vector<1x32x16xf32> to vector<32x16xf32>
    %c0_2 = arith.constant 0 : index
    %c0_3 = arith.constant 0 : index
    %2 = vector.load %arg3[%c0_2, %c0_3] : memref<32x128xf32, #tpu.memory_space<vmem>>, vector<32x128xf32>
    %cst = arith.constant dense<0.000000e+00> : vector<16x128xf32>
    %3 = tpu.matmul %1, %2, %cst {dimension_numbers = #tpu.dot_dimension_numbers<[0], [0], [1], [1], [0, 1, 1, 1], [], []>} : vector<32x16xf32>, vector<32x128xf32>, vector<16x128xf32> -> vector<16x128xf32>
    %c0_4 = arith.constant 0 : index
    %c0_5 = arith.constant 0 : index
    %4 = vector.load %arg4[%c0_4, %c0_5] : memref<1x128xf32, #tpu.memory_space<vmem>>, vector<1x128xf32>
    %5 = vector.broadcast %4 : vector<1x128xf32> to vector<16x128xf32>
    %6 = arith.addf %3, %5 : vector<16x128xf32>
    %cst_6 = arith.constant dense<0xFF800000> : vector<16xf32>
    %7 = vector.multi_reduction <maximumf>, %6, %cst_6 [1] : vector<16x128xf32> to vector<16xf32>
    %8 = vector.shape_cast %7 : vector<16xf32> to vector<16x1xf32>
    %9 = vector.broadcast %8 : vector<16x1xf32> to vector<16x128xf32>
    %10 = arith.subf %6, %9 : vector<16x128xf32>
    %11 = math.exp %10 : vector<16x128xf32>
    %cst_7 = arith.constant dense<0.000000e+00> : vector<16xf32>
    %12 = vector.multi_reduction <add>, %11, %cst_7 [1] : vector<16x128xf32> to vector<16xf32>
    %13 = vector.shape_cast %12 : vector<16xf32> to vector<16x1xf32>
    %14 = math.log %13 : vector<16x1xf32>
    %15 = vector.broadcast %14 : vector<16x1xf32> to vector<16x128xf32>
    %16 = arith.subf %10, %15 : vector<16x128xf32>
    %17 = vector.extract_strided_slice %16 {offsets = [0, 0], sizes = [16, 8], strides = [1, 1]} : vector<16x128xf32> to vector<16x8xf32>
    %c0_8 = arith.constant 0 : index
    %c0_9 = arith.constant 0 : index
    %c0_10 = arith.constant 0 : index
    %18 = vector.load %arg5[%c0_8, %c0_9, %c0_10] : memref<1x16x8xf32, #tpu.memory_space<vmem>>, vector<1x16x8xf32>
    %19 = vector.shape_cast %18 : vector<1x16x8xf32> to vector<16x8xf32>
    %20 = vector.shape_cast %17 : vector<16x8xf32> to vector<1x16x8xf32>
    tpu.vector_store %arg5[%c0_8, %c0_9, %c0_10], %20 {strides = array<i32>} : memref<1x16x8xf32, #tpu.memory_space<vmem>>, vector<1x16x8xf32>,
    return
  }
  func.func @transform_0(%arg0: i32, %arg1: i32) -> (i32, i32, i32) {
    %c0_i32 = arith.constant 0 : i32
    %c0_i32_0 = arith.constant 0 : i32
    return %arg0, %c0_i32, %arg1 : i32, i32, i32
  }
  func.func @transform_1(%arg0: i32, %arg1: i32) -> (i32, i32) {
    %c0_i32 = arith.constant 0 : i32
    %c0_i32_0 = arith.constant 0 : i32
    %c0_i32_1 = arith.constant 0 : i32
    return %c0_i32, %c0_i32_0 : i32, i32
  }
  func.func @transform_2(%arg0: i32, %arg1: i32) -> (i32, i32) {
    %c0_i32 = arith.constant 0 : i32
    %c0_i32_0 = arith.constant 0 : i32
    %c0_i32_1 = arith.constant 0 : i32
    return %c0_i32, %c0_i32_0 : i32, i32
  }
  func.func @transform_3(%arg0: i32, %arg1: i32) -> (i32, i32, i32) {
    %c0_i32 = arith.constant 0 : i32
    %c0_i32_0 = arith.constant 0 : i32
    return %arg0, %arg1, %c0_i32 : i32, i32, i32
  }
}

</mosaic_0001>

<bundles_post_ra>
// kernel: tpu_custom_call.1
= control target key start
LH: loop header
LB: loop body
LE: loop exit
PB: predicated region body
PF: predicated region fallthrough
CT: control target
= control target key end

     0   :  { %s486_s12 = smov 0   ;;  %s488_s13 = smov 0   ;;  %s538_s0 = inlined_call_operand.vmem [shape: f32[2,32,16], index: 0, kind: input, shape index: {}]   ;;  %s539_s1 = inlined_call_operand.vmem [shape: f32[32,128], index: 1, kind: input, shape index: {}]   ;;  %s540_s2 = inlined_call_operand.vmem [shape: f32[1,128], index: 2, kind: input, shape index: {}]   ;;  %s541_s3 = inlined_call_operand.vmem [shape: f32[2,16,8], index: 3, kind: output, shape index: {}]  }
   0x1   :  { %s490_s14 = smov 0  }
   0x2 LB: > { %s25_s15 = sadd.s32 1, %s460_s13  ;;  %p393_p0 = scmp.ge.s32.totalorder %s464_s14, 1  ;;  %s464_s14 = sphi %s490_s14, %s13_s14   ;;  %s460_s13 = sphi %s488_s13, %s543_s13   ;;  %s456_s12 = sphi %s486_s12, %s542_s12  }
   0x3   : > { %p27_p1 = scmp.ge.s32.totalorder %s25_s15, 2  ;;  %p156_p2 = scmp.lt.s32.totalorder %s464_s14, 3 }
   0x5   : > { %s545_s15 = smov (%p27_p1, %s25_s15), 0  ;;  %p157_p3 = pnand %p393_p0, %p156_p2 }
   0x6   : > { %p187_p4 = scmp.lt.s32.totalorder (!%p157_p3), %s456_s12, 1 }
   0x7   : > { %160 = sbr.rel (%p157_p3) target bundleno = 572 (0x23c), region = 32 }
   0xc   : > { %v212_v0 = vld [vmem:[%s539_s1 + $0x18] sm:$0xff]  ;;  %v211_v1 = vld [vmem:[%s539_s1 + $0x10] sm:$0xff]  ;;  %s547_s12 = smov (!%p187_p4, %s456_s12), 1  ;;  %v210_v2 = vld [vmem:[%s539_s1 + $0x8] sm:$0xff]  ;;  %vm249_vm0 = vcmask 261120   ;;  %vm299_vm1 = vcmask 64512  }
   0xd   : > { %268 = vmatpush.msra.mxu0 %v212_v0  ;;  %404 = vmatpush.msra.mxu1 %v212_v0  ;;  %s402_s22 = sshll.u32 %s547_s12, 5  ;;  %v209_v3 = vld [vmem:[%s539_s1] sm:$0xff]  ;;  %s403_s30 = sshll.u32 %s547_s12, 4 }
   0xe   : > { %s194_s27 = scalar_lea.vmem %s538_s0, %s402_s22  ;;  %v433_v10 = vld [vmem:[%s540_s2] ss:$0 sm:$0xff]  ;;  %s203_s6 = scalar_lea.vmem %s541_s3, %s403_s30 }
   0xf   : > { %269 = vmatpush.msra.mxu0 %v211_v1  ;;  %405 = vmatpush.msra.mxu1 %v211_v1  ;;  %v205_v4 = vld [vmem:[%s194_s27] sm:$0xff]  ;;  %v206_v5 = vld [vmem:[%s194_s27 + $0x8] sm:$0xff]  ;;  %v207_v6 = vld [vmem:[%s194_s27 + $0x10] sm:$0xff] }
  0x10   : > { %217 = vxpose.xlu0.b32.start [1/4] (short) (narrow) %v205_v4, 16  ;;  %v208_v7 = vld [vmem:[%s194_s27 + $0x18] sm:$0xff] }
  0x11   : > { %270 = vmatpush.msra.mxu0 %v210_v2  ;;  %406 = vmatpush.msra.mxu1 %v210_v2 }
  0x13   : > { %271 = vmatpush.msra.mxu0 %v209_v3  ;;  %407 = vmatpush.msra.mxu1 %v209_v3 }
  0x18   : > { %218 = vxpose.xlu0.b32.cont [2/4] (short) (narrow) %v206_v5, 16 }
  0x20   : > { %219 = vxpose.xlu0.b32.cont [3/4] (short) (narrow) %v207_v6, 16 }
  0x28   : > { %220 = vxpose.xlu0.b32.end [4/4] (short) (narrow) %v208_v7, 16 }
  0xb4   : > { %v233_v8 = vpop.trf.xlu0 }
  0xb5   : > { %398 = vmatmul.msk.f32.vlgmr.msra.gmra.mxu0 %vm249_vm0, %v233_v8 }
  0xbc   : > { %v234_v9 = vpop.trf.xlu0 }
  0xbd   : > { %399 = vmatmul.msk.f32.vlgmr.msra.gmra.mxu1 %vm249_vm0, %v234_v9 }
 0x132   : > { %v273_v11 = vpop.f32.mrf.mxu0 }
 0x133   : > { %v274_v12 = vadd.f32 %v433_v10, %v273_v11 }
 0x135   : > { %279 = vmax.xlane.f32.xlu1 %v274_v12 }
 0x13a   : > { %v276_v13 = vpop.f32.mrf.mxu1 }
 0x13b   : > { %v277_v14 = vadd.f32 %v433_v10, %v276_v13 }
 0x13d   : > { %281 = vmax.xlane.f32.xlu1 %v277_v14 }
 0x1a8   : > { %v280_v15 = vpop.xlane.xlu1 %279 }
 0x1a9   : > { %v283_v16 = vsub.f32 %v274_v12, %v280_v15 }
 0x1ab   : > { %v285_v17 = vmul.f32 1.442695, %v283_v16 }
 0x1ad   : > { %434 = vpow2.f32 %v285_v17 }
 0x1b0   : > { %v282_v18 = vpop.xlane.xlu1 %281 }
 0x1b1   : > { %v284_v19 = vsub.f32 %v277_v14, %v282_v18 }
 0x1b3   : > { %v435_v20 = vpop.eup %434  ;;  %v287_v21 = vmul.f32 1.442695, %v284_v19 }
 0x1b4   : > { %289 = vadd.xlane.f32.xlu2 %v435_v20 }
 0x1b5   : > { %436 = vpow2.f32 %v287_v21 }
 0x1bb   : > { %v437_v22 = vpop.eup %436 }
 0x1bc   : > { %291 = vadd.xlane.f32.xlu2 %v437_v22 }
 0x227   : > { %v290_v23 = vpop.xlane.xlu2 %289 }
 0x228   : > { %438 = vlog2.f32 %v290_v23 }
 0x22e   : > { %v439_v24 = vpop.eup %438 }
 0x22f   : > { %v294_v25 = vmul.f32 0.6931472, %v439_v24  ;;  %v292_v26 = vpop.xlane.xlu2 %291 }
 0x230   : > { %440 = vlog2.f32 %v292_v26 }
 0x231   : > { %v297_v27 = vsub.f32 %v283_v16, %v294_v25 }
 0x233   : > { %300 = vst.msk [vmem:[%s203_s6] sm:$0xff] %vm299_vm1, %v297_v27 }
 0x236   : > { %v441_v28 = vpop.eup %440 }
 0x237   : > { %v296_v29 = vmul.f32 0.6931472, %v441_v28 }
 0x239   : > { %v298_v30 = vsub.f32 %v284_v19, %v296_v29 }
 0x23b   : > { %301 = vst.msk [vmem:[%s203_s6 + $0x8] sm:$0xff] %vm299_vm1, %v298_v30 }
 0x23c PF: > { %s13_s14 = sadd.s32 1, %s464_s14   ;;  %s542_s12 = smov %s460_s13 }
 0x23d   : > { %p10_p5 = scmp.ge.s32.totalorder %s13_s14, 4   ;;  %s543_s13 = smov %s545_s15 }
 0x23f   :  { %12 = sbr.rel (!%p10_p5) target bundleno = 2 (0x2), region = 62 }

</bundles_post_ra>
